<compile_context>
chip_gen: v7x
topology: tpu7x:2x2x1
jax: 0.10.0
libtpu: 0.0.40
codegen_flags: <defaults>
</compile_context>

<pallas_src>
import math

import jax
import jax.numpy as jnp
from jax import lax
from jax.experimental import pallas as pl
from jax.experimental.pallas import tpu as pltpu

# ---------------- synthetic "args" / model dims ----------------
NUM_CLASS = 10      # args.num_class
LOW_DIM = 16        # args.low_dim
HIDDEN = 32         # synthesized encoder hidden width
MOCO_QUEUE = 16     # args.moco_queue
MOCO_M = 0.999      # args.moco_m
PROTO_M = 0.99      # args.proto_m
EPS = 1e-12         # F.normalize default eps
LOG_PROTO_M = math.log(PROTO_M)

# image dims used by the synthetic encoder (NCHW flattened row-major, like .view(B,-1))
C_IMG, H_IMG, W_IMG = 3, 8, 8
D_IN = C_IMG * H_IMG * W_IMG            # 192

# ---- packed-parameter slab layout (both encoders share this layout) ----
LANES = 128                              # lane-dense pad width
HEAD_W = NUM_CLASS + LOW_DIM             # fused head output width (26)
assert D_IN % 8 == 0 and HIDDEN <= LANES and HEAD_W <= LANES
R_W1 = 0                                 # rows [0, D_IN): w1 (D_IN, HIDDEN) in cols [0, HIDDEN)
R_B1 = D_IN                              # row R_B1: b1 (HIDDEN,) in cols [0, HIDDEN)
R_WH = R_B1 + 8                          # rows [R_WH, R_WH+128): fused head weight (zero-padded)
R_BH = R_WH + LANES                      # row R_BH: fused head bias (HEAD_W,)
SLAB_ROWS = R_BH + 8                     # 336 (multiple of 8)


# ---------------- fused Pallas kernel ----------------

def _pico_fused_kernel(xq_ref, xk_ref, py_ref, ptr_ref, proto_ref, queue_ref,
                       qp_ref, pq_ref, pk_ref,
                       bc_ref, fs_ref, proto_out_ref, queue_out_ref,
                       qp_out_ref, pk_out_ref):
    f32 = jnp.float32

    # ---- read old persistent state before any (aliased) state write ----
    protos = proto_ref[...]                      # (C, L)   old prototypes
    old_queue = queue_ref[...]                   # (Q, L)
    old_qp = qp_ref[...]                         # (Q, 1)

    # ---- momentum update of the key-encoder slab (one fused elementwise blend) ----
    pk_out_ref[...] = MOCO_M * pk_ref[...] + (1.0 - MOCO_M) * pq_ref[...]

    def l2norm(z):
        # x / max(||x||, eps) == x * rsqrt(max(||x||^2, eps^2)); rsqrt -> EUP.
        ss = jnp.sum(z * z, axis=1, keepdims=True)
        return z * lax.rsqrt(jnp.maximum(ss, EPS * EPS))

    def encoder(x, slab_ref):
        # TODO(synk): cast MXU operands to bf16 once the toy MLP is a real encoder.
        w1 = slab_ref[R_W1:R_W1 + D_IN, :]       # (D_IN, 128), cols >= HIDDEN are 0
        b1 = slab_ref[R_B1:R_B1 + 1, :]          # (1, 128)
        wh = slab_ref[R_WH:R_WH + LANES, :]      # (128, 128), fused [classifier|proj]
        bh = slab_ref[R_BH:R_BH + 1, :]          # (1, 128)
        h = jnp.maximum(jnp.dot(x, w1, preferred_element_type=f32) + b1, 0.0)
        return jnp.dot(h, wh, preferred_element_type=f32) + bh   # (B, 128)

    heads_q = encoder(xq_ref[...], pq_ref)       # cols: [logits | proj | 0-pad]
    heads_k = encoder(xk_ref[...], pk_out_ref)   # key encoder uses blended params

    logits = heads_q[:, 0:NUM_CLASS]             # (B, C)
    q = l2norm(heads_q[:, NUM_CLASS:HEAD_W])     # (B, L)
    k = l2norm(heads_k[:, NUM_CLASS:HEAD_W])     # (B, L)
    nb = logits.shape[0]

    # ---- pseudo labels: argmax(softmax(logits) * partial_Y) ----
    # argmax is invariant to the (positive) softmax denominator -> skip the divide.
    ps = jnp.exp(logits - jnp.max(logits, axis=1, keepdims=True)) * py_ref[...]
    mx = jnp.max(ps, axis=1, keepdims=True)
    col = lax.broadcasted_iota(jnp.int32, ps.shape, 1)
    # first index attaining the max (matches torch.max tie-breaking)
    first_idx = jnp.min(jnp.where(ps == mx, col, NUM_CLASS),
                        axis=1, keepdims=True)                   # (B, 1) int32
    pseudo_col = first_idx.astype(f32)                           # (B, 1)

    # ---- score_prot = softmax(q @ OLD_prototypes^T), exact divide ----
    lp = lax.dot_general(q, protos, (((1,), (1,)), ((), ())),
                         preferred_element_type=f32)             # (B, C)
    e2 = jnp.exp(lp - jnp.max(lp, axis=1, keepdims=True))
    score = e2 / jnp.sum(e2, axis=1, keepdims=True)

    # ---- prototype momentum update: closed form of the sequential loop ----
    # proto_c_new = m^count_c * proto_c + (1-m) * sum_i m^{later_i} * q_i
    onehot = (col == first_idx).astype(f32)                      # (B, C)
    ri = lax.broadcasted_iota(jnp.int32, (nb, nb), 0)
    ci = lax.broadcasted_iota(jnp.int32, (nb, nb), 1)
    upper = (ci > ri).astype(f32)                                # (B, B)
    # TODO(synk): swap for an O(B*C) prefix-count form once B is large (v7x VMEM).
    later_pc = lax.dot_general(upper, onehot, (((1,), (0,)), ((), ())),
                               preferred_element_type=f32)       # (B, C)
    later = jnp.sum(onehot * later_pc, axis=1, keepdims=True)    # (B, 1)
    wvec = (1.0 - PROTO_M) * jnp.exp(later * LOG_PROTO_M)        # (B, 1)
    rhs = jnp.concatenate([q * wvec, jnp.ones((nb, 1), f32)], axis=1)   # (B, L+1)
    comb = lax.dot_general(onehot, rhs, (((0,), (0,)), ((), ())),
                           preferred_element_type=f32)           # (C, L+1)
    delta = comb[:, 0:LOW_DIM]                                   # (C, L)
    count = comb[:, LOW_DIM:LOW_DIM + 1]                         # (C, 1)
    scale = jnp.exp(count * LOG_PROTO_M)                         # (C, 1)
    proto_out_ref[...] = l2norm(scale * protos + delta)

    # ---- dequeue/enqueue (ptr is always a multiple of B, the same invariant
    #      the PyTorch code asserts via moco_queue % batch_size == 0) ----
    nq = old_queue.shape[0]
    ptr = ptr_ref[0]
    row = lax.broadcasted_iota(jnp.int32, (nq, 1), 0)
    in_win = (row >= ptr) & (row < ptr + nb)                     # (Q, 1)
    reps = nq // nb
    queue_out_ref[...] = jnp.where(in_win,
                                   jnp.concatenate([k] * reps, axis=0),
                                   old_queue)
    qp_out_ref[...] = jnp.where(in_win,
                                jnp.concatenate([pseudo_col] * reps, axis=0),
                                old_qp)

    # ---- lane-dense output slabs (single full stores, wrapper slices) ----
    feats = jnp.concatenate([q, k, old_queue], axis=0)           # (2B+Q, L)
    plabs = jnp.concatenate([pseudo_col, pseudo_col, old_qp], axis=0)
    fs_ref[...] = jnp.concatenate(
        [feats, plabs, jnp.zeros((feats.shape[0], LANES - LOW_DIM - 1), f32)],
        axis=1)
    bc_ref[...] = jnp.concatenate(
        [logits, score, jnp.zeros((nb, LANES - 2 * NUM_CLASS), f32)], axis=1)


# ---------------- Pallas wrapper (single gridless call) ----------------

def pico_fused_call(x_q, x_k, partial_Y, queue_ptr, prototypes, queue,
                    queue_pseudo, params_q, params_k):
    b = x_q.shape[0]
    c, l = prototypes.shape
    nq = queue.shape[0]
    assert nq % b == 0   # same invariant as PyTorch _dequeue_and_enqueue
    vmem = pl.BlockSpec(memory_space=pltpu.MemorySpace.VMEM)
    smem = pl.BlockSpec(memory_space=pltpu.MemorySpace.SMEM)
    out_shape = (
        jax.ShapeDtypeStruct((b, LANES), jnp.float32),            # 0: [logits | score_prot]
        jax.ShapeDtypeStruct((2 * b + nq, LANES), jnp.float32),   # 1: [features | pseudo]
        jax.ShapeDtypeStruct((c, l), jnp.float32),                # 2: prototypes'
        jax.ShapeDtypeStruct((nq, l), jnp.float32),               # 3: queue'
        jax.ShapeDtypeStruct((nq, 1), jnp.float32),               # 4: queue_pseudo'
        jax.ShapeDtypeStruct(params_k.shape, params_k.dtype),     # 5: params_k'
    )
    return pl.pallas_call(
        _pico_fused_kernel,
        in_specs=[vmem, vmem, vmem, smem, vmem, vmem, vmem, vmem, vmem],
        out_specs=tuple([vmem] * len(out_shape)),
        out_shape=out_shape,
        # In-place state updates (P8): prototypes, queue, queue_pseudo, params_k.
        input_output_aliases={4: 2, 5: 3, 6: 4, 8: 5},
        cost_estimate=pl.CostEstimate(flops=800_000, transcendentals=128,
                                      bytes_accessed=540_000),
    )(x_q, x_k, partial_Y, queue_ptr, prototypes, queue, queue_pseudo,
      params_q, params_k)


# ---------------- PiCO forward (training path) ----------------

def _pico_forward(img_q, im_k, partial_Y, state):
    b = img_q.shape[0]
    x_q = img_q.reshape(b, -1)
    x_k = im_k.reshape(b, -1)

    bc, fs, protos_new, queue_new, qp_new, pk_new = pico_fused_call(
        x_q, x_k, partial_Y, state["queue_ptr"], state["prototypes"],
        state["queue"], state["queue_pseudo"], state["params_q"],
        state["params_k"])

    output = bc[:, :NUM_CLASS]
    score_prot = bc[:, NUM_CLASS:2 * NUM_CLASS]
    features = fs[:, :LOW_DIM]
    pseudo_labels = fs[:, LOW_DIM]
    ptr_new = ((state["queue_ptr"] + b) % MOCO_QUEUE).astype(jnp.int32)

    new_state = dict(params_q=state["params_q"], params_k=pk_new,
                     queue=queue_new, queue_pseudo=qp_new,
                     queue_ptr=ptr_new, prototypes=protos_new)
    return (output, features, pseudo_labels, score_prot), new_state


pico_forward = jax.jit(_pico_forward)


# ---------------- deterministic parameter / buffer init ----------------

def _pack_params(w1, b1, wc, bcl, wp, bp):
    slab = jnp.zeros((SLAB_ROWS, LANES), jnp.float32)
    slab = slab.at[R_W1:R_W1 + D_IN, 0:HIDDEN].set(w1)
    slab = slab.at[R_B1, 0:HIDDEN].set(b1)
    slab = slab.at[R_WH:R_WH + HIDDEN, 0:HEAD_W].set(
        jnp.concatenate([wc, wp], axis=1))
    slab = slab.at[R_BH, 0:HEAD_W].set(jnp.concatenate([bcl, bp], axis=0))
    return slab


def init_state(key):
    ks = jax.random.split(key, 5)
    scale = 0.05
    w1 = scale * jax.random.normal(ks[0], (D_IN, HIDDEN), jnp.float32)
    b1 = jnp.zeros((HIDDEN,), jnp.float32)
    wc = scale * jax.random.normal(ks[1], (HIDDEN, NUM_CLASS), jnp.float32)
    bcl = jnp.zeros((NUM_CLASS,), jnp.float32)
    wp = scale * jax.random.normal(ks[2], (HIDDEN, LOW_DIM), jnp.float32)
    bp = jnp.zeros((LOW_DIM,), jnp.float32)
    params_q = _pack_params(w1, b1, wc, bcl, wp, bp)
    params_k = jnp.copy(params_q)    # encoder_k initialised as a copy of encoder_q

    queue = jax.random.normal(ks[3], (MOCO_QUEUE, LOW_DIM), jnp.float32)
    # __init__ does F.normalize(self.queue, dim=0)
    queue = queue / jnp.maximum(
        jnp.sqrt(jnp.sum(queue * queue, axis=0, keepdims=True)), EPS)
    queue_pseudo = jax.random.normal(ks[4], (MOCO_QUEUE, 1), jnp.float32)
    queue_ptr = jnp.zeros((1,), jnp.int32)
    prototypes = jnp.zeros((NUM_CLASS, LOW_DIM), jnp.float32)

    return dict(params_q=params_q, params_k=params_k, queue=queue,
                queue_pseudo=queue_pseudo, queue_ptr=queue_ptr,
                prototypes=prototypes)


if __name__ == "__main__":
    key = jax.random.PRNGKey(0)
    B = 4                                    # MOCO_QUEUE % B == 0
    k_img, k_k, k_py, k_state = jax.random.split(key, 4)

    img_q = jax.random.normal(k_img, (B, C_IMG, H_IMG, W_IMG), jnp.float32)
    im_k = jax.random.normal(k_k, (B, C_IMG, H_IMG, W_IMG), jnp.float32)
    partial_Y = (jax.random.uniform(k_py, (B, NUM_CLASS)) < 0.5).astype(jnp.float32)
    # make sure every sample has at least one candidate label
    partial_Y = jnp.maximum(
        partial_Y, jax.nn.one_hot(jnp.arange(B) % NUM_CLASS, NUM_CLASS))

    state = init_state(k_state)

    (output, features, pseudo_labels, score_prot), new_state = pico_forward(
        img_q, im_k, partial_Y, state)

    jax.block_until_ready((output, features, pseudo_labels, score_prot,
                           new_state))
    assert output.shape == (B, NUM_CLASS)
    assert features.shape == (2 * B + MOCO_QUEUE, LOW_DIM)
    assert pseudo_labels.shape == (2 * B + MOCO_QUEUE,)
    assert score_prot.shape == (B, NUM_CLASS)
    print("KERNEL_OK")
</pallas_src>

<mosaic_0001>
module attributes {stable_mosaic.version = 11 : i64} {
  func.func @_pico_fused_kernel(%arg0: memref<4x192xf32, #tpu.memory_space<vmem>>, %arg1: memref<4x192xf32, #tpu.memory_space<vmem>>, %arg2: memref<4x10xf32, #tpu.memory_space<vmem>>, %arg3: memref<1xi32, #tpu.memory_space<smem>>, %arg4: memref<10x16xf32, #tpu.memory_space<vmem>>, %arg5: memref<16x16xf32, #tpu.memory_space<vmem>>, %arg6: memref<16x1xf32, #tpu.memory_space<vmem>>, %arg7: memref<336x128xf32, #tpu.memory_space<vmem>>, %arg8: memref<336x128xf32, #tpu.memory_space<vmem>>, %arg9: memref<4x128xf32, #tpu.memory_space<vmem>>, %arg10: memref<24x128xf32, #tpu.memory_space<vmem>>, %arg11: memref<10x16xf32, #tpu.memory_space<vmem>>, %arg12: memref<16x16xf32, #tpu.memory_space<vmem>>, %arg13: memref<16x1xf32, #tpu.memory_space<vmem>>, %arg14: memref<336x128xf32, #tpu.memory_space<vmem>>) attributes {dimension_semantics = [], scalar_prefetch = 0 : i64, scratch_operands = 0 : i64, tpu.core_type = #tpu.core_type<tc>} {
    %c0 = arith.constant 0 : index
    %c0_0 = arith.constant 0 : index
    %0 = vector.load %arg4[%c0, %c0_0] : memref<10x16xf32, #tpu.memory_space<vmem>>, vector<10x16xf32>
    %c0_1 = arith.constant 0 : index
    %c0_2 = arith.constant 0 : index
    %1 = vector.load %arg5[%c0_1, %c0_2] : memref<16x16xf32, #tpu.memory_space<vmem>>, vector<16x16xf32>
    %c0_3 = arith.constant 0 : index
    %c0_4 = arith.constant 0 : index
    %2 = vector.load %arg6[%c0_3, %c0_4] : memref<16x1xf32, #tpu.memory_space<vmem>>, vector<16x1xf32>
    %c0_5 = arith.constant 0 : index
    %c0_6 = arith.constant 0 : index
    %3 = vector.load %arg8[%c0_5, %c0_6] : memref<336x128xf32, #tpu.memory_space<vmem>>, vector<336x128xf32>
    %cst = arith.constant 9.990000e-01 : f32
    %4 = vector.broadcast %cst : f32 to vector<336x128xf32>
    %5 = arith.mulf %4, %3 : vector<336x128xf32>
    %c0_7 = arith.constant 0 : index
    %c0_8 = arith.constant 0 : index
    %6 = vector.load %arg7[%c0_7, %c0_8] : memref<336x128xf32, #tpu.memory_space<vmem>>, vector<336x128xf32>
    %cst_9 = arith.constant 1.000000e-03 : f32
    %7 = vector.broadcast %cst_9 : f32 to vector<336x128xf32>
    %8 = arith.mulf %7, %6 : vector<336x128xf32>
    %9 = arith.addf %5, %8 : vector<336x128xf32>
    %c0_10 = arith.constant 0 : index
    %c0_11 = arith.constant 0 : index
    %10 = vector.load %arg14[%c0_10, %c0_11] : memref<336x128xf32, #tpu.memory_space<vmem>>, vector<336x128xf32>
    tpu.vector_store %arg14[%c0_10, %c0_11], %9 {strides = array<i32>} : memref<336x128xf32, #tpu.memory_space<vmem>>, vector<336x128xf32>,
    %c0_12 = arith.constant 0 : index
    %c0_13 = arith.constant 0 : index
    %11 = vector.load %arg0[%c0_12, %c0_13] : memref<4x192xf32, #tpu.memory_space<vmem>>, vector<4x192xf32>
    %c0_14 = arith.constant 0 : index
    %c0_15 = arith.constant 0 : index
    %12 = vector.load %arg7[%c0_14, %c0_15] : memref<336x128xf32, #tpu.memory_space<vmem>>, vector<192x128xf32>
    %c192 = arith.constant 192 : index
    %c0_16 = arith.constant 0 : index
    %13 = vector.load %arg7[%c192, %c0_16] : memref<336x128xf32, #tpu.memory_space<vmem>>, vector<1x128xf32>
    %c200 = arith.constant 200 : index
    %c0_17 = arith.constant 0 : index
    %14 = vector.load %arg7[%c200, %c0_17] : memref<336x128xf32, #tpu.memory_space<vmem>>, vector<128x128xf32>
    %c328 = arith.constant 328 : index
    %c0_18 = arith.constant 0 : index
    %15 = vector.load %arg7[%c328, %c0_18] : memref<336x128xf32, #tpu.memory_space<vmem>>, vector<1x128xf32>
    %cst_19 = arith.constant dense<0.000000e+00> : vector<4x128xf32>
    %16 = tpu.matmul %11, %12, %cst_19 {dimension_numbers = #tpu.dot_dimension_numbers<[1], [0], [0], [1], [0, 0, 1, 1], [], []>} : vector<4x192xf32>, vector<192x128xf32>, vector<4x128xf32> -> vector<4x128xf32>
    %17 = vector.broadcast %13 : vector<1x128xf32> to vector<4x128xf32>
    %18 = arith.addf %16, %17 : vector<4x128xf32>
    %cst_20 = arith.constant 0.000000e+00 : f32
    %19 = vector.broadcast %cst_20 : f32 to vector<4x128xf32>
    %20 = arith.maximumf %18, %19 : vector<4x128xf32>
    %cst_21 = arith.constant dense<0.000000e+00> : vector<4x128xf32>
    %21 = tpu.matmul %20, %14, %cst_21 {dimension_numbers = #tpu.dot_dimension_numbers<[1], [0], [0], [1], [0, 0, 1, 1], [], []>} : vector<4x128xf32>, vector<128x128xf32>, vector<4x128xf32> -> vector<4x128xf32>
    %22 = vector.broadcast %15 : vector<1x128xf32> to vector<4x128xf32>
    %23 = arith.addf %21, %22 : vector<4x128xf32>
    %c0_22 = arith.constant 0 : index
    %c0_23 = arith.constant 0 : index
    %24 = vector.load %arg1[%c0_22, %c0_23] : memref<4x192xf32, #tpu.memory_space<vmem>>, vector<4x192xf32>
    %c0_24 = arith.constant 0 : index
    %c0_25 = arith.constant 0 : index
    %25 = vector.load %arg14[%c0_24, %c0_25] : memref<336x128xf32, #tpu.memory_space<vmem>>, vector<192x128xf32>
    %c192_26 = arith.constant 192 : index
    %c0_27 = arith.constant 0 : index
    %26 = vector.load %arg14[%c192_26, %c0_27] : memref<336x128xf32, #tpu.memory_space<vmem>>, vector<1x128xf32>
    %c200_28 = arith.constant 200 : index
    %c0_29 = arith.constant 0 : index
    %27 = vector.load %arg14[%c200_28, %c0_29] : memref<336x128xf32, #tpu.memory_space<vmem>>, vector<128x128xf32>
    %c328_30 = arith.constant 328 : index
    %c0_31 = arith.constant 0 : index
    %28 = vector.load %arg14[%c328_30, %c0_31] : memref<336x128xf32, #tpu.memory_space<vmem>>, vector<1x128xf32>
    %cst_32 = arith.constant dense<0.000000e+00> : vector<4x128xf32>
    %29 = tpu.matmul %24, %25, %cst_32 {dimension_numbers = #tpu.dot_dimension_numbers<[1], [0], [0], [1], [0, 0, 1, 1], [], []>} : vector<4x192xf32>, vector<192x128xf32>, vector<4x128xf32> -> vector<4x128xf32>
    %30 = vector.broadcast %26 : vector<1x128xf32> to vector<4x128xf32>
    %31 = arith.addf %29, %30 : vector<4x128xf32>
    %cst_33 = arith.constant 0.000000e+00 : f32
    %32 = vector.broadcast %cst_33 : f32 to vector<4x128xf32>
    %33 = arith.maximumf %31, %32 : vector<4x128xf32>
    %cst_34 = arith.constant dense<0.000000e+00> : vector<4x128xf32>
    %34 = tpu.matmul %33, %27, %cst_34 {dimension_numbers = #tpu.dot_dimension_numbers<[1], [0], [0], [1], [0, 0, 1, 1], [], []>} : vector<4x128xf32>, vector<128x128xf32>, vector<4x128xf32> -> vector<4x128xf32>
    %35 = vector.broadcast %28 : vector<1x128xf32> to vector<4x128xf32>
    %36 = arith.addf %34, %35 : vector<4x128xf32>
    %37 = vector.extract_strided_slice %23 {offsets = [0, 0], sizes = [4, 10], strides = [1, 1]} : vector<4x128xf32> to vector<4x10xf32>
    %38 = vector.extract_strided_slice %23 {offsets = [0, 10], sizes = [4, 16], strides = [1, 1]} : vector<4x128xf32> to vector<4x16xf32>
    %39 = arith.mulf %38, %38 : vector<4x16xf32>
    %cst_35 = arith.constant dense<0.000000e+00> : vector<4xf32>
    %40 = vector.multi_reduction <add>, %39, %cst_35 [1] : vector<4x16xf32> to vector<4xf32>
    %41 = vector.shape_cast %40 : vector<4xf32> to vector<4x1xf32>
    %cst_36 = arith.constant 1.000000e-24 : f32
    %42 = vector.broadcast %cst_36 : f32 to vector<4x1xf32>
    %43 = arith.maximumf %41, %42 : vector<4x1xf32>
    %44 = math.rsqrt %43 : vector<4x1xf32>
    %45 = vector.broadcast %44 : vector<4x1xf32> to vector<4x16xf32>
    %46 = arith.mulf %38, %45 : vector<4x16xf32>
    %47 = vector.extract_strided_slice %36 {offsets = [0, 10], sizes = [4, 16], strides = [1, 1]} : vector<4x128xf32> to vector<4x16xf32>
    %48 = arith.mulf %47, %47 : vector<4x16xf32>
    %cst_37 = arith.constant dense<0.000000e+00> : vector<4xf32>
    %49 = vector.multi_reduction <add>, %48, %cst_37 [1] : vector<4x16xf32> to vector<4xf32>
    %50 = vector.shape_cast %49 : vector<4xf32> to vector<4x1xf32>
    %cst_38 = arith.constant 1.000000e-24 : f32
    %51 = vector.broadcast %cst_38 : f32 to vector<4x1xf32>
    %52 = arith.maximumf %50, %51 : vector<4x1xf32>
    %53 = math.rsqrt %52 : vector<4x1xf32>
    %54 = vector.broadcast %53 : vector<4x1xf32> to vector<4x16xf32>
    %55 = arith.mulf %47, %54 : vector<4x16xf32>
    %cst_39 = arith.constant dense<0xFF800000> : vector<4xf32>
    %56 = vector.multi_reduction <maximumf>, %37, %cst_39 [1] : vector<4x10xf32> to vector<4xf32>
    %57 = vector.shape_cast %56 : vector<4xf32> to vector<4x1xf32>
    %58 = vector.broadcast %57 : vector<4x1xf32> to vector<4x10xf32>
    %59 = arith.subf %37, %58 : vector<4x10xf32>
    %60 = math.exp %59 : vector<4x10xf32>
    %c0_40 = arith.constant 0 : index
    %c0_41 = arith.constant 0 : index
    %61 = vector.load %arg2[%c0_40, %c0_41] : memref<4x10xf32, #tpu.memory_space<vmem>>, vector<4x10xf32>
    %62 = arith.mulf %60, %61 : vector<4x10xf32>
    %cst_42 = arith.constant dense<0xFF800000> : vector<4xf32>
    %63 = vector.multi_reduction <maximumf>, %62, %cst_42 [1] : vector<4x10xf32> to vector<4xf32>
    %64 = vector.shape_cast %63 : vector<4xf32> to vector<4x1xf32>
    %65 = tpu.iota {dimensions = array<i32: 1>} : vector<4x10xi32>
    %66 = vector.broadcast %64 : vector<4x1xf32> to vector<4x10xf32>
    %67 = arith.cmpf oeq, %62, %66 : vector<4x10xf32>
    %c10_i32 = arith.constant 10 : i32
    %68 = vector.broadcast %c10_i32 : i32 to vector<4x10xi32>
    %69 = arith.select %67, %65, %68 : vector<4x10xi1>, vector<4x10xi32>
    %cst_43 = arith.constant dense<2147483647> : vector<4xi32>
    %70 = vector.multi_reduction <minsi>, %69, %cst_43 [1] : vector<4x10xi32> to vector<4xi32>
    %71 = vector.shape_cast %70 : vector<4xi32> to vector<4x1xi32>
    %72 = arith.sitofp %71 : vector<4x1xi32> to vector<4x1xf32>
    %cst_44 = arith.constant dense<0.000000e+00> : vector<4x10xf32>
    %73 = tpu.matmul %46, %0, %cst_44 {dimension_numbers = #tpu.dot_dimension_numbers<[1], [1], [0], [0], [0, 0, 1, 0], [], []>} : vector<4x16xf32>, vector<10x16xf32>, vector<4x10xf32> -> vector<4x10xf32>
    %cst_45 = arith.constant dense<0xFF800000> : vector<4xf32>
    %74 = vector.multi_reduction <maximumf>, %73, %cst_45 [1] : vector<4x10xf32> to vector<4xf32>
    %75 = vector.shape_cast %74 : vector<4xf32> to vector<4x1xf32>
    %76 = vector.broadcast %75 : vector<4x1xf32> to vector<4x10xf32>
    %77 = arith.subf %73, %76 : vector<4x10xf32>
    %78 = math.exp %77 : vector<4x10xf32>
    %cst_46 = arith.constant dense<0.000000e+00> : vector<4xf32>
    %79 = vector.multi_reduction <add>, %78, %cst_46 [1] : vector<4x10xf32> to vector<4xf32>
    %80 = vector.shape_cast %79 : vector<4xf32> to vector<4x1xf32>
    %81 = vector.broadcast %80 : vector<4x1xf32> to vector<4x10xf32>
    %82 = arith.divf %78, %81 : vector<4x10xf32>
    %83 = vector.broadcast %71 : vector<4x1xi32> to vector<4x10xi32>
    %84 = arith.cmpi eq, %65, %83 : vector<4x10xi32>
    %85 = arith.extui %84 : vector<4x10xi1> to vector<4x10xi32>
    %86 = arith.sitofp %85 : vector<4x10xi32> to vector<4x10xf32>
    %87 = tpu.iota {dimensions = array<i32: 0>} : vector<4x4xi32>
    %88 = tpu.iota {dimensions = array<i32: 1>} : vector<4x4xi32>
    %89 = arith.cmpi sgt, %88, %87 : vector<4x4xi32>
    %90 = arith.extui %89 : vector<4x4xi1> to vector<4x4xi32>
    %91 = arith.sitofp %90 : vector<4x4xi32> to vector<4x4xf32>
    %cst_47 = arith.constant dense<0.000000e+00> : vector<4x10xf32>
    %92 = tpu.matmul %91, %86, %cst_47 {dimension_numbers = #tpu.dot_dimension_numbers<[1], [0], [0], [1], [0, 0, 1, 1], [], []>} : vector<4x4xf32>, vector<4x10xf32>, vector<4x10xf32> -> vector<4x10xf32>
    %93 = arith.mulf %86, %92 : vector<4x10xf32>
    %cst_48 = arith.constant dense<0.000000e+00> : vector<4xf32>
    %94 = vector.multi_reduction <add>, %93, %cst_48 [1] : vector<4x10xf32> to vector<4xf32>
    %95 = vector.shape_cast %94 : vector<4xf32> to vector<4x1xf32>
    %cst_49 = arith.constant -0.0100503359 : f32
    %96 = vector.broadcast %cst_49 : f32 to vector<4x1xf32>
    %97 = arith.mulf %95, %96 : vector<4x1xf32>
    %98 = math.exp %97 : vector<4x1xf32>
    %cst_50 = arith.constant 0.00999999977 : f32
    %99 = vector.broadcast %cst_50 : f32 to vector<4x1xf32>
    %100 = arith.mulf %99, %98 : vector<4x1xf32>
    %101 = vector.broadcast %100 : vector<4x1xf32> to vector<4x16xf32>
    %102 = arith.mulf %46, %101 : vector<4x16xf32>
    %cst_51 = arith.constant 1.000000e+00 : f32
    %103 = vector.broadcast %cst_51 : f32 to vector<4x1xf32>
    %104 = tpu.concatenate %102, %103 in 1 : vector<4x16xf32>, vector<4x1xf32> -> vector<4x17xf32>
    %cst_52 = arith.constant dense<0.000000e+00> : vector<10x17xf32>
    %105 = tpu.matmul %86, %104, %cst_52 {dimension_numbers = #tpu.dot_dimension_numbers<[0], [0], [1], [1], [0, 1, 1, 1], [], []>} : vector<4x10xf32>, vector<4x17xf32>, vector<10x17xf32> -> vector<10x17xf32>
    %106 = vector.extract_strided_slice %105 {offsets = [0, 0], sizes = [10, 16], strides = [1, 1]} : vector<10x17xf32> to vector<10x16xf32>
    %107 = vector.extract_strided_slice %105 {offsets = [0, 16], sizes = [10, 1], strides = [1, 1]} : vector<10x17xf32> to vector<10x1xf32>
    %cst_53 = arith.constant -0.0100503359 : f32
    %108 = vector.broadcast %cst_53 : f32 to vector<10x1xf32>
    %109 = arith.mulf %107, %108 : vector<10x1xf32>
    %110 = math.exp %109 : vector<10x1xf32>
    %111 = vector.broadcast %110 : vector<10x1xf32> to vector<10x16xf32>
    %112 = arith.mulf %111, %0 : vector<10x16xf32>
    %113 = arith.addf %112, %106 : vector<10x16xf32>
    %114 = arith.mulf %113, %113 : vector<10x16xf32>
    %cst_54 = arith.constant dense<0.000000e+00> : vector<10xf32>
    %115 = vector.multi_reduction <add>, %114, %cst_54 [1] : vector<10x16xf32> to vector<10xf32>
    %116 = vector.shape_cast %115 : vector<10xf32> to vector<10x1xf32>
    %cst_55 = arith.constant 1.000000e-24 : f32
    %117 = vector.broadcast %cst_55 : f32 to vector<10x1xf32>
    %118 = arith.maximumf %116, %117 : vector<10x1xf32>
    %119 = math.rsqrt %118 : vector<10x1xf32>
    %120 = vector.broadcast %119 : vector<10x1xf32> to vector<10x16xf32>
    %121 = arith.mulf %113, %120 : vector<10x16xf32>
    %c0_56 = arith.constant 0 : index
    %c0_57 = arith.constant 0 : index
    %122 = vector.load %arg11[%c0_56, %c0_57] : memref<10x16xf32, #tpu.memory_space<vmem>>, vector<10x16xf32>
    tpu.vector_store %arg11[%c0_56, %c0_57], %121 {strides = array<i32>} : memref<10x16xf32, #tpu.memory_space<vmem>>, vector<10x16xf32>,
    %c0_58 = arith.constant 0 : index
    %123 = memref.load %arg3[%c0_58] : memref<1xi32, #tpu.memory_space<smem>>
    %124 = tpu.iota {dimensions = array<i32: 0>} : vector<16x1xi32>
    %125 = vector.broadcast %123 : i32 to vector<16x1xi32>
    %126 = arith.cmpi sge, %124, %125 : vector<16x1xi32>
    %c4_i32 = arith.constant 4 : i32
    %127 = arith.addi %123, %c4_i32 : i32
    %128 = vector.broadcast %127 : i32 to vector<16x1xi32>
    %129 = arith.cmpi slt, %124, %128 : vector<16x1xi32>
    %130 = arith.andi %126, %129 : vector<16x1xi1>
    %131 = tpu.concatenate %55, %55, %55, %55 in 0 : vector<4x16xf32>, vector<4x16xf32>, vector<4x16xf32>, vector<4x16xf32> -> vector<16x16xf32>
    %132 = vector.shape_cast %130 : vector<16x1xi1> to vector<16x1xi1>
    %133 = vector.broadcast %132 : vector<16x1xi1> to vector<16x16xi1>
    %134 = arith.select %133, %131, %1 : vector<16x16xi1>, vector<16x16xf32>
    %c0_59 = arith.constant 0 : index
    %c0_60 = arith.constant 0 : index
    %135 = vector.load %arg12[%c0_59, %c0_60] : memref<16x16xf32, #tpu.memory_space<vmem>>, vector<16x16xf32>
    tpu.vector_store %arg12[%c0_59, %c0_60], %134 {strides = array<i32>} : memref<16x16xf32, #tpu.memory_space<vmem>>, vector<16x16xf32>,
    %136 = tpu.concatenate %72, %72, %72, %72 in 0 : vector<4x1xf32>, vector<4x1xf32>, vector<4x1xf32>, vector<4x1xf32> -> vector<16x1xf32>
    %137 = arith.select %130, %136, %2 : vector<16x1xi1>, vector<16x1xf32>
    %c0_61 = arith.constant 0 : index
    %c0_62 = arith.constant 0 : index
    %138 = vector.load %arg13[%c0_61, %c0_62] : memref<16x1xf32, #tpu.memory_space<vmem>>, vector<16x1xf32>
    tpu.vector_store %arg13[%c0_61, %c0_62], %137 {strides = array<i32>} : memref<16x1xf32, #tpu.memory_space<vmem>>, vector<16x1xf32>,
    %139 = tpu.concatenate %46, %55, %1 in 0 : vector<4x16xf32>, vector<4x16xf32>, vector<16x16xf32> -> vector<24x16xf32>
    %140 = tpu.concatenate %72, %72, %2 in 0 : vector<4x1xf32>, vector<4x1xf32>, vector<16x1xf32> -> vector<24x1xf32>
    %cst_63 = arith.constant 0.000000e+00 : f32
    %141 = vector.broadcast %cst_63 : f32 to vector<24x111xf32>
    %142 = tpu.concatenate %139, %140, %141 in 1 : vector<24x16xf32>, vector<24x1xf32>, vector<24x111xf32> -> vector<24x128xf32>
    %c0_64 = arith.constant 0 : index
    %c0_65 = arith.constant 0 : index
    %143 = vector.load %arg10[%c0_64, %c0_65] : memref<24x128xf32, #tpu.memory_space<vmem>>, vector<24x128xf32>
    tpu.vector_store %arg10[%c0_64, %c0_65], %142 {strides = array<i32>} : memref<24x128xf32, #tpu.memory_space<vmem>>, vector<24x128xf32>,
    %cst_66 = arith.constant 0.000000e+00 : f32
    %144 = vector.broadcast %cst_66 : f32 to vector<4x108xf32>
    %145 = tpu.concatenate %37, %82, %144 in 1 : vector<4x10xf32>, vector<4x10xf32>, vector<4x108xf32> -> vector<4x128xf32>
    %c0_67 = arith.constant 0 : index
    %c0_68 = arith.constant 0 : index
    %146 = vector.load %arg9[%c0_67, %c0_68] : memref<4x128xf32, #tpu.memory_space<vmem>>, vector<4x128xf32>
    tpu.vector_store %arg9[%c0_67, %c0_68], %145 {strides = array<i32>} : memref<4x128xf32, #tpu.memory_space<vmem>>, vector<4x128xf32>,
    return
  }
}

</mosaic_0001>

<bundles_post_ra>
// kernel: _pico_forward.1
= control target key start
LH: loop header
LB: loop body
LE: loop exit
PB: predicated region body
PF: predicated region fallthrough
CT: control target
= control target key end

     0   :  { %v1505_v0 = vmov 0.0|0.0   ;;  %vm346_vm0 = vcmask 523264   ;;  %vm1506_vm1 = vmmov 0   ;;  %v1507_v63 = vmov 0.0   ;;  %s1508_s17 = smov 118   ;;  %s1510_s16 = smov 10   ;;  %s2391_s7 = inlined_call_operand.vmem [shape: f32[336,128], index: 7, kind: input, shape index: {}]   ;;  %s2392_s0 = inlined_call_operand.vmem [shape: f32[4,192], index: 0, kind: input, shape index: {}]   ;;  %s2393_s2 = inlined_call_operand.vmem [shape: f32[4,10], index: 2, kind: input, shape index: {}]   ;;  %s2394_s8 = inlined_call_operand.vmem [shape: f32[336,128], index: 8, kind: input, shape index: {}, may-alias: {8,14}]   ;;  %s2395_s14 = inlined_call_operand.vmem [shape: f32[336,128], index: 14, kind: output, shape index: {5}, may-alias: {8,14}]   ;;  %s2396_s1 = inlined_call_operand.vmem [shape: f32[4,192], index: 1, kind: input, shape index: {}]   ;;  %s2397_s3 = inlined_call_operand.<no memory space> [shape: s32[1], index: 3, kind: input, shape index: {}]   ;;  %s2398_s6 = inlined_call_operand.vmem [shape: f32[16,1], index: 6, kind: input, shape index: {}, may-alias: {6,13}]   ;;  %s2399_s13 = inlined_call_operand.vmem [shape: f32[16,1], index: 13, kind: output, shape index: {4}, may-alias: {6,13}]   ;;  %s2400_s4 = inlined_call_operand.vmem [shape: f32[10,16], index: 4, kind: input, shape index: {}, may-alias: {4,11}]   ;;  %s2401_s5 = inlined_call_operand.vmem [shape: f32[16,16], index: 5, kind: input, shape index: {}, may-alias: {5,12}]   ;;  %s2402_s9 = inlined_call_operand.vmem [shape: f32[4,128], index: 9, kind: output, shape index: {0}]   ;;  %s2403_s10 = inlined_call_operand.vmem [shape: f32[24,128], index: 10, kind: output, shape index: {1}]   ;;  %s2404_s12 = inlined_call_operand.vmem [shape: f32[16,16], index: 12, kind: output, shape index: {3}, may-alias: {5,12}]   ;;  %s2405_s11 = inlined_call_operand.vmem [shape: f32[10,16], index: 11, kind: output, shape index: {2}, may-alias: {4,11}]  }
   0x1   :  { %1350 = vmatprep.subr.bf16.mxu0 %v1505_v0  ;;  %v1591_v1 = vld [vmem:[%s2391_s7] sm:$0xff]  ;;  %v1596_v2 = vld [vmem:[%s2391_s7 + $0x8] sm:$0xff]  ;;  %v1601_v3 = vld [vmem:[%s2391_s7 + $0x10] sm:$0xff]  ;;  %1386 = vmatprep.subr.bf16.mxu1 %v1505_v0  ;;  %vm713_vm2 = vcmask 76800   ;;  %vm695_vm5 = vcmask 125952   ;;  %s1096_s29 = sadd.s32 4, %s2397_s3 }
   0x2   :  { %v1351_v4 = vpack.c.bf16 %v1596_v2, %v1591_v1  ;;  %v1609_v5 = vld [vmem:[%s2391_s7 + $0x18] sm:$0xff]  ;;  %v1617_v7 = vld [vmem:[%s2391_s7 + $0x20] sm:$0xff]  ;;  %v1622_v8 = vld [vmem:[%s2391_s7 + $0x28] sm:$0xff]  ;;  %1295 = vmatprep.mubr.msk.f32.mxu1 %vm1506_vm1, %v1507_v63  ;;  %vm850_vm9 = vcmask 1043456   ;;  %vm846_vm13 = vcmask 31744  }
   0x3   :  { %v1354_v6 = vpack.c.bf16 %v1609_v5, %v1601_v3  ;;  %v1357_v9 = vpack.c.bf16 %v1622_v8, %v1617_v7  ;;  %v1629_v10 = vld [vmem:[%s2391_s7 + $0x30] sm:$0xff]  ;;  %v1634_v11 = vld [vmem:[%s2391_s7 + $0x38] sm:$0xff]  ;;  %v1640_v12 = vld [vmem:[%s2392_s0] sm:$0xff] }
   0x4   :  { %1352 = vmatpush1.bf16.msra.mxu0 %v1351_v4  ;;  %v1645_v13 = vld [vmem:[%s2391_s7 + $0xc8] sm:$0xff]  ;;  %v1650_v14 = vld [vmem:[%s2391_s7 + $0xd0] sm:$0xff]  ;;  %v345_v15 = vcombine.high %v1640_v12, %v1640_v12  ;;  %v1659_v17 = vld [vmem:[%s2391_s7 + $0xd8] sm:$0xff]  ;;  %v1360_v19 = vpack.c.bf16 %v1634_v11, %v1629_v10 }
   0x5   :  { %1353 = vmatprep.subr.bf16.mxu0 %v1505_v0  ;;  %v1387_v16 = vpack.c.bf16 %v1650_v14, %v1645_v13  ;;  %v1664_v18 = vld [vmem:[%s2391_s7 + $0xe0] sm:$0xff]  ;;  %v1678_v21 = vld [vmem:[%s2391_s7 + $0x48] sm:$0xff]  ;;  %v1691_v24 = vld [vmem:[%s2391_s7 + $0xf0] sm:$0xff] }
   0x6   :  { %1206 = vmatprep.mubr.msk.f32.mxu0 %vm346_vm0, %v345_v15  ;;  %v1673_v20 = vld [vmem:[%s2391_s7 + $0x40] sm:$0xff]  ;;  %v1390_v22 = vpack.c.bf16 %v1664_v18, %v1659_v17  ;;  %v1686_v23 = vld [vmem:[%s2391_s7 + $0xe8] sm:$0xff]  ;;  %v1699_v26 = vld [vmem:[%s2391_s7 + $0x50] sm:$0xff] }
   0x7   :  { %1388 = vmatpush3.bf16.msra.mxu1 %v1387_v16  ;;  %v1363_v25 = vpack.c.bf16 %v1678_v21, %v1673_v20  ;;  %v1704_v27 = vld [vmem:[%s2391_s7 + $0x58] sm:$0xff]  ;;  %v1393_v28 = vpack.c.bf16 %v1691_v24, %v1686_v23  ;;  %v1717_v30 = vld [vmem:[%s2391_s7 + $0x100] sm:$0xff]  ;;  %v1730_v33 = vld [vmem:[%s2391_s7 + $0x68] sm:$0xff] }
   0x8   :  { %1355 = vmatpush1.bf16.msra.mxu0 %v1354_v6  ;;  %1389 = vmatprep.subr.bf16.mxu1 %v1505_v0  ;;  %v1712_v29 = vld [vmem:[%s2391_s7 + $0xf8] sm:$0xff]  ;;  %v1366_v31 = vpack.c.bf16 %v1704_v27, %v1699_v26  ;;  %v1725_v32 = vld [vmem:[%s2391_s7 + $0x60] sm:$0xff]  ;;  %v1738_v35 = vld [vmem:[%s2391_s7 + $0x108] sm:$0xff] }
   0x9   :  { %1356 = vmatprep.subr.bf16.mxu0 %v1505_v0  ;;  %v1396_v34 = vpack.c.bf16 %v1717_v30, %v1712_v29  ;;  %v1743_v36 = vld [vmem:[%s2391_s7 + $0x110] sm:$0xff]  ;;  %v1369_v37 = vpack.c.bf16 %v1730_v33, %v1725_v32  ;;  %v1756_v39 = vld [vmem:[%s2391_s7 + $0x78] sm:$0xff]  ;;  %v1769_v42 = vld [vmem:[%s2391_s7 + $0x120] sm:$0xff] }
   0xa   :  { %v1751_v38 = vld [vmem:[%s2391_s7 + $0x70] sm:$0xff]  ;;  %v1399_v40 = vpack.c.bf16 %v1743_v36, %v1738_v35  ;;  %v1764_v41 = vld [vmem:[%s2391_s7 + $0x118] sm:$0xff]  ;;  %v1777_v44 = vld [vmem:[%s2391_s7 + $0x80] sm:$0xff] }
   0xb   :  { %1391 = vmatpush3.bf16.msra.mxu1 %v1390_v22  ;;  %v1372_v43 = vpack.c.bf16 %v1756_v39, %v1751_v38  ;;  %v1782_v45 = vld [vmem:[%s2391_s7 + $0x88] sm:$0xff]  ;;  %v1402_v46 = vpack.c.bf16 %v1769_v42, %v1764_v41  ;;  %v1795_v48 = vld [vmem:[%s2391_s7 + $0x130] sm:$0xff]  ;;  %v1808_v51 = vld [vmem:[%s2391_s7 + $0x98] sm:$0xff] }
   0xc   :  { %1358 = vmatpush1.bf16.msra.mxu0 %v1357_v9  ;;  %1392 = vmatprep.subr.bf16.mxu1 %v1505_v0  ;;  %v1790_v47 = vld [vmem:[%s2391_s7 + $0x128] sm:$0xff]  ;;  %v1375_v49 = vpack.c.bf16 %v1782_v45, %v1777_v44  ;;  %v1803_v50 = vld [vmem:[%s2391_s7 + $0x90] sm:$0xff]  ;;  %v1819_v54 = vld [vmem:[%s2391_s7 + $0xa0] sm:$0xff] }
   0xd   :  { %1359 = vmatprep.subr.bf16.mxu0 %v1505_v0  ;;  %v1405_v52 = vpack.c.bf16 %v1795_v48, %v1790_v47  ;;  %v1378_v53 = vpack.c.bf16 %v1808_v51, %v1803_v50  ;;  %v1824_v55 = vld [vmem:[%s2391_s7 + $0xa8] sm:$0xff]  ;;  %v1833_v57 = vld [vmem:[%s2391_s7 + $0xb0] sm:$0xff]  ;;  %v1838_v58 = vld [vmem:[%s2391_s7 + $0xb8] sm:$0xff] }
   0xe   :  { %v1381_v56 = vpack.c.bf16 %v1824_v55, %v1819_v54  ;;  %v1384_v59 = vpack.c.bf16 %v1838_v58, %v1833_v57  ;;  %v1848_v60 = vld [vmem:[%s2391_s7 + $0x138] sm:$0xff]  ;;  %v1853_v61 = vld [vmem:[%s2391_s7 + $0x140] sm:$0xff]  ;;  %v1207_v16 = vld [vmem:[%s2391_s7 + $0x148] ss:$0 sm:$0xff] }
   0xf   :  { %1394 = vmatpush3.bf16.msra.mxu1 %v1393_v28  ;;  %v1408_v62 = vpack.c.bf16 %v1853_v61, %v1848_v60  ;;  %v1205_v4 = vld [vmem:[%s2391_s7 + $0xc0] ss:$0 sm:$0xff] }
  0x10   :  { %1361 = vmatpush1.bf16.msra.mxu0 %v1360_v19  ;;  %1395 = vmatprep.subr.bf16.mxu1 %v1505_v0 }
  0x11   :  { %1362 = vmatprep.subr.bf16.mxu0 %v1505_v0 }
  0x13   :  { %1397 = vmatpush3.bf16.msra.mxu1 %v1396_v34 }
  0x14   :  { %1364 = vmatpush1.bf16.msra.mxu0 %v1363_v25  ;;  %1398 = vmatprep.subr.bf16.mxu1 %v1505_v0 }
  0x15   :  { %1365 = vmatprep.subr.bf16.mxu0 %v1505_v0 }
  0x17   :  { %1400 = vmatpush3.bf16.msra.mxu1 %v1399_v40  ;;  %v720_v40 = vld [vmem:[%s2393_s2] sm:$0xf] }
  0x18   :  { %1367 = vmatpush1.bf16.msra.mxu0 %v1366_v31  ;;  %1401 = vmatprep.subr.bf16.mxu1 %v1505_v0 }
  0x19   :  { %1368 = vmatprep.subr.bf16.mxu0 %v1505_v0 }
  0x1b   :  { %1403 = vmatpush3.bf16.msra.mxu1 %v1402_v46 }
  0x1c   :  { %1370 = vmatpush1.bf16.msra.mxu0 %v1369_v37  ;;  %1404 = vmatprep.subr.bf16.mxu1 %v1505_v0 }
  0x1d   :  { %1371 = vmatprep.subr.bf16.mxu0 %v1505_v0 }
  0x1f   :  { %1406 = vmatpush3.bf16.msra.mxu1 %v1405_v52 }
  0x20   :  { %1373 = vmatpush1.bf16.msra.mxu0 %v1372_v43  ;;  %1407 = vmatprep.subr.bf16.mxu1 %v1505_v0 }
  0x21   :  { %1374 = vmatprep.subr.bf16.mxu0 %v1505_v0 }
  0x23   :  { %1409 = vmatpush3.bf16.msra.mxu1 %v1408_v62 }
  0x24   :  { %1376 = vmatpush1.bf16.msra.mxu0 %v1375_v49  ;;  %1410 = vmatprep.subr.bf16.mxu1 %v1505_v0 }
  0x25   :  { %1377 = vmatprep.subr.bf16.mxu0 %v1505_v0 }
  0x28   :  { %1379 = vmatpush1.bf16.msra.mxu0 %v1378_v53  ;;  %v725_v53 = vlaneseq }
  0x29   :  { %1380 = vmatprep.subr.bf16.mxu0 %v1505_v0 }
  0x2c   :  { %1382 = vmatpush1.bf16.msra.mxu0 %v1381_v56  ;;  %v1881_v56 = vand.u32 127, %v725_v53 }
  0x2d   :  { %1383 = vmatprep.subr.bf16.mxu0 %v1505_v0 }
  0x30   :  { %1385 = vmatpush1.bf16.msra.mxu0 %v1384_v59 }
  0x31   :  { %1446 = vmatprep.subr.bf16.mxu0 %v1505_v0 }
  0x33   :  { %414 = vmatmul.mubr.f32.vlgmr.msra.gmra.mrb[0].mxu0 %v1640_v12 }
  0x34   :  { %1330 = vmatprep.mubr.msk.f32.mxu0 %vm1506_vm1, %v1507_v63 }
 0x106   :  { %v415_v6 = vpop.f32.mrb[0].mxu0 }
 0x107   :  { %v416_v9 = vadd.f32 %v1205_v4, %v415_v6  ;;  %v417_v12 = vpop.f32.mrb[1].mxu0 }
 0x108   :  { %v171_v12 = vmul.f32 0.001, %v1591_v1 }
 0x109   :  { %v419_v15 = vmax.f32 %v416_v9, 0.0 }
 0x10b   :  { %1296 = vmatmul.mubr.f32.vlgmr.msra.gmra.mrb[0].mxu1 %v419_v15  ;;  %v172_v15 = vmul.f32 0.001, %v1596_v2  ;;  %v48_v2 = vld [vmem:[%s2394_s8 + $0x18] sm:$0xff] }
 0x1de   :  { %v490_v19 = vpop.f32.mrb[0].mxu1 }
 0x1df   :  { %v1868_v22 = vadd.f32 %v1207_v16, %v490_v19  ;;  %v1297_v25 = vpop.f32.mrb[1].mxu1  ;;  %v173_v16 = vmul.f32 0.001, %v1601_v3  ;;  %v45_v19 = vld [vmem:[%s2394_s8] sm:$0xff] }
 0x1e0   :  { %v46_v25 = vld [vmem:[%s2394_s8 + $0x8] sm:$0xff]  ;;  %v49_v3 = vld [vmem:[%s2394_s8 + $0x20] sm:$0xff] }
 0x1e1   :  { %v714_v28 = vsel %vm713_vm2, %v1868_v22, -inf  ;;  %v690_v52 = vmul.f32 %v1868_v22, %v1868_v22  ;;  %v88_v1 = vmul.f32 0.999, %v46_v25 }
 0x1e2   :  { %715 = vmax.xlane.f32.xlu0 %v714_v28  ;;  %v47_v28 = vld [vmem:[%s2394_s8 + $0x10] sm:$0xff] }
 0x26f   :  { %v716_v31 = vpop.xlane.xlu0 %715 }
 0x270   :  { %v717_v34 = vsub.f32 %v1868_v22, %v716_v31  ;;  %v174_v31 = vmul.f32 0.001, %v1609_v5  ;;  %v51_v5 = vld [vmem:[%s2394_s8 + $0x30] sm:$0xff] }
 0x272   :  { %v718_v37 = vmul.f32 1.442695, %v717_v34  ;;  %v87_v34 = vmul.f32 0.999, %v45_v19 }
 0x274   :  { %1485 = vpow2.f32 %v718_v37  ;;  %v89_v37 = vmul.f32 0.999, %v47_v28  ;;  %v175_v28 = vmul.f32 0.001, %v1617_v7  ;;  %v93_v7 = vmul.f32 0.999, %v51_v5 }
 0x276   :  { %v215_v19 = vadd.f32 %v173_v16, %v89_v37  ;;  %v178_v37 = vmul.f32 0.001, %v1634_v11 }
 0x27e   :  { %v1486_v43 = vpop.eup %1485 }
 0x27f   :  { %v721_v46 = vmul.f32 %v1486_v43, %v720_v40  ;;  %v90_v40 = vmul.f32 0.999, %v48_v2  ;;  %v50_v43 = vld [vmem:[%s2394_s8 + $0x28] sm:$0xff]  ;;  %v176_v2 = vmul.f32 0.001, %v1622_v8 }
 0x280   :  { %v177_v8 = vmul.f32 0.001, %v1629_v10 }
 0x281   :  { %v722_v49 = vsel %vm713_vm2, %v721_v46, -inf  ;;  %v216_v25 = vadd.f32 %v174_v31, %v90_v40 }
 0x282   :  { %723 = vmax.xlane.f32.xlu0 %v722_v49  ;;  %v214_v49 = vadd.f32 %v172_v15, %v88_v1  ;;  %v55_v15 = vld [vmem:[%s2394_s8 + $0x50] sm:$0xff]  ;;  %v1953_v5 = vadd.f32 %v177_v8, %v93_v7  ;;  %v184_v8 = vmul.f32 0.001, %v1730_v33 }
 0x298   :  { %692 = vrot.lane.b32.xlu0 %v690_v52, %s1508_s17  ;;  %v91_v52 = vmul.f32 0.999, %v49_v3 }
 0x29a   :  { %v217_v1 = vadd.f32 %v175_v28, %v91_v52  ;;  %v179_v52 = vmul.f32 0.001, %v1673_v20  ;;  %v181_v28 = vmul.f32 0.001, %v1699_v26 }
 0x30f   :  { %v724_v59 = vpop.xlane.xlu0 %723 }
 0x310   :  { %vm727_vm3 = vcmp.eq.f32.partialorder %v721_v46, %v724_v59  ;;  %v213_v46 = vadd.f32 %v171_v12, %v87_v34  ;;  %v92_v59 = vmul.f32 0.999, %v50_v43  ;;  %v54_v12 = vld [vmem:[%s2394_s8 + $0x48] sm:$0xff]  ;;  %v1414_v34 = vpack.c.bf16 %v216_v25, %v215_v19 }
 0x311   :  { %v728_v62 = vsel %vm727_vm3, %v1881_v56, 10  ;;  %vm748_vm3 = vcmask 130048  }
 0x312   :  { %v1885_v4 = vsel %vm713_vm2, %v728_v62, 2147483647  ;;  %v52_v62 = vld [vmem:[%s2394_s8 + $0x38] sm:$0xff]  ;;  %v1411_v16 = vpack.c.bf16 %v214_v49, %v213_v46  ;;  %v218_v3 = vadd.f32 %v176_v2, %v92_v59  ;;  %v180_v59 = vmul.f32 0.001, %v1678_v21 }
 0x313   :  { %v731_v6 = vshra.s32 %v1885_v4, 16  ;;  %v94_v31 = vmul.f32 0.999, %v52_v62  ;;  %v97_v62 = vmul.f32 0.999, %v55_v15 }
 0x314   :  { %1412 = vmatpush1.bf16.msra.mxu1 %v1411_v16  ;;  %v182_v21 = vmul.f32 0.001, %v1704_v27  ;;  %v1417_v2 = vpack.c.bf16 %v218_v3, %v217_v1 }
 0x315   :  { %v1888_v9 = vcvt.s32.f32 %v731_v6  ;;  %v53_v6 = vld [vmem:[%s2394_s8 + $0x40] sm:$0xff]  ;;  %1413 = vmatprep.subr.bf16.mxu1 %v1505_v0  ;;  %v1963_v11 = vadd.f32 %v178_v37, %v94_v31  ;;  %v1993_v26 = vadd.f32 %v181_v28, %v97_v62  ;;  %v183_v31 = vmul.f32 0.001, %v1725_v32 }
 0x316   :  { %255 = vst [vmem:[%s2395_s14] sm:$0xff] %v213_v46  ;;  %256 = vst [vmem:[%s2395_s14 + $0x8] sm:$0xff] %v214_v49  ;;  %v95_v46 = vmul.f32 0.999, %v53_v6  ;;  %v96_v49 = vmul.f32 0.999, %v54_v12 }
 0x317   :  { %734 = vmin.xlane.f32.xlu1 %v1888_v9  ;;  %257 = vst [vmem:[%s2395_s14 + $0x10] sm:$0xff] %v215_v19  ;;  %258 = vst [vmem:[%s2395_s14 + $0x18] sm:$0xff] %v216_v25  ;;  %v185_v32 = vmul.f32 0.001, %v1751_v38  ;;  %v187_v62 = vmul.f32 0.001, %v1777_v44 }
 0x318   :  { %v1976_v19 = vadd.f32 %v179_v52, %v95_v46  ;;  %v1984_v12 = vadd.f32 %v180_v59, %v96_v49  ;;  %1415 = vmatpush1.bf16.msra.mxu1 %v1414_v34 }
 0x319   :  { %1416 = vmatprep.subr.bf16.mxu1 %v1505_v0 }
 0x31c   :  { %1418 = vmatpush1.bf16.msra.mxu1 %v1417_v2 }
 0x31d   :  { %1419 = vmatprep.subr.bf16.mxu1 %v1505_v0 }
 0x31e   :  { %v56_v40 = vld [vmem:[%s2394_s8 + $0x58] sm:$0xff]  ;;  %v57_v10 = vld [vmem:[%s2394_s8 + $0x60] sm:$0xff]  ;;  %v58_v43 = vld [vmem:[%s2394_s8 + $0x68] sm:$0xff] }
 0x31f   :  { %259 = vst [vmem:[%s2395_s14 + $0x20] sm:$0xff] %v217_v1  ;;  %260 = vst [vmem:[%s2395_s14 + $0x28] sm:$0xff] %v218_v3  ;;  %v98_v25 = vmul.f32 0.999, %v56_v40  ;;  %v99_v15 = vmul.f32 0.999, %v57_v10 }
 0x320   :  { %v100_v16 = vmul.f32 0.999, %v58_v43  ;;  %v186_v10 = vmul.f32 0.001, %v1756_v39  ;;  %v1420_v39 = vpack.c.bf16 %v1963_v11, %v1953_v5 }
 0x321   :  { %v1995_v27 = vadd.f32 %v182_v21, %v98_v25  ;;  %v225_v33 = vadd.f32 %v183_v31, %v99_v15  ;;  %v189_v21 = vmul.f32 0.001, %v1803_v50  ;;  %v1423_v50 = vpack.c.bf16 %v1984_v12, %v1976_v19 }
 0x322   :  { %v226_v40 = vadd.f32 %v184_v8, %v100_v16  ;;  %v191_v8 = vmul.f32 0.001, %v1819_v54  ;;  %1421 = vmatpush1.bf16.msra.mxu1 %v1420_v39  ;;  %v196_v39 = vmul.f32 0.001, %v1645_v13  ;;  %v199_v13 = vmul.f32 0.001, %v1664_v18 }
 0x323   :  { %1422 = vmatprep.subr.bf16.mxu1 %v1505_v0 }
 0x326   :  { %v59_v6 = vld [vmem:[%s2394_s8 + $0x70] sm:$0xff]  ;;  %v60_v20 = vld [vmem:[%s2394_s8 + $0x78] sm:$0xff]  ;;  %1424 = vmatpush1.bf16.msra.mxu1 %v1423_v50 }
 0x327   :  { %261 = vst [vmem:[%s2395_s14 + $0x30] sm:$0xff] %v1953_v5  ;;  %262 = vst [vmem:[%s2395_s14 + $0x38] sm:$0xff] %v1963_v11  ;;  %v101_v3 = vmul.f32 0.999, %v59_v6  ;;  %v102_v37 = vmul.f32 0.999, %v60_v20  ;;  %1425 = vmatprep.subr.bf16.mxu1 %v1505_v0 }
 0x328   :  { %v188_v20 = vmul.f32 0.001, %v1782_v45  ;;  %v190_v45 = vmul.f32 0.001, %v1808_v51 }
 0x329   :  { %v227_v49 = vadd.f32 %v185_v32, %v101_v3  ;;  %v228_v6 = vadd.f32 %v186_v10, %v102_v37  ;;  %v193_v3 = vmul.f32 0.001, %v1833_v57  ;;  %v1426_v37 = vpack.c.bf16 %v1995_v27, %v1993_v26 }
 0x32b   :  { %1427 = vmatpush1.bf16.msra.mxu1 %v1426_v37  ;;  %v1432_v32 = vpack.c.bf16 %v228_v6, %v227_v49  ;;  %v204_v37 = vmul.f32 0.001, %v1738_v35 }
 0x32c   :  { %1428 = vmatprep.subr.bf16.mxu1 %v1505_v0 }
 0x32e   :  { %v61_v7 = vld [vmem:[%s2394_s8 + $0x80] sm:$0xff] }
 0x32f   :  { %263 = vst [vmem:[%s2395_s14 + $0x40] sm:$0xff] %v1976_v19  ;;  %v103_v52 = vmul.f32 0.999, %v61_v7  ;;  %v194_v19 = vmul.f32 0.001, %v1838_v58  ;;  %v1429_v58 = vpack.c.bf16 %v226_v40, %v225_v33 }
 0x331   :  { %v229_v11 = vadd.f32 %v187_v62, %v103_v52  ;;  %1430 = vmatpush1.bf16.msra.mxu1 %v1429_v58 }
 0x332   :  { %1431 = vmatprep.subr.bf16.mxu1 %v1505_v0 }
 0x335   :  { %1433 = vmatpush1.bf16.msra.mxu1 %v1432_v32 }
 0x336   :  { %v62_v1 = vld [vmem:[%s2394_s8 + $0x88] sm:$0xff]  ;;  %v63_v34 = vld [vmem:[%s2394_s8 + $0x90] sm:$0xff]  ;;  %1434 = vmatprep.subr.bf16.mxu1 %v1505_v0 }
 0x337   :  { %264 = vst [vmem:[%s2395_s14 + $0x48] sm:$0xff] %v1984_v12  ;;  %265 = vst [vmem:[%s2395_s14 + $0x50] sm:$0xff] %v1993_v26  ;;  %v104_v59 = vmul.f32 0.999, %v62_v1  ;;  %v105_v25 = vmul.f32 0.999, %v63_v34 }
 0x338   :  { %266 = vst [vmem:[%s2395_s14 + $0x58] sm:$0xff] %v1995_v27  ;;  %v192_v1 = vmul.f32 0.001, %v1824_v55 }
 0x339   :  { %v230_v2 = vadd.f32 %v188_v20, %v104_v59  ;;  %v231_v7 = vadd.f32 %v189_v21, %v105_v25  ;;  %v494_v59 = vld [vmem:[%s2396_s1] sm:$0xff]  ;;  %v198_v21 = vmul.f32 0.001, %v1659_v17 }
 0x33a   :  { %v542_v62 = vcombine.high %v494_v59, %v494_v59 }
 0x33b   :  { %v1435_v26 = vpack.c.bf16 %v230_v2, %v229_v11 }
 0x33c   :  { %1209 = vmatprep.mubr.msk.f32.mxu1 %vm346_vm0, %v542_v62  ;;  %vm1136_vm0 = vcmask 7168  }
 0x33d   :  { %1436 = vmatpush1.bf16.msra.mxu1 %v1435_v26  ;;  %v205_v26 = vmul.f32 0.001, %v1743_v36 }
 0x33e   :  { %1437 = vmatprep.subr.bf16.mxu1 %v1505_v0 }
 0x33f   :  { %v64_v43 = vld [vmem:[%s2394_s8 + $0x98] sm:$0xff]  ;;  %v65_v38 = vld [vmem:[%s2394_s8 + $0xa0] sm:$0xff]  ;;  %v66_v46 = vld [vmem:[%s2394_s8 + $0xa8] sm:$0xff] }
 0x340   :  { %267 = vst [vmem:[%s2395_s14 + $0x60] sm:$0xff] %v225_v33  ;;  %268 = vst [vmem:[%s2395_s14 + $0x68] sm:$0xff] %v226_v40  ;;  %v106_v28 = vmul.f32 0.999, %v64_v43  ;;  %v107_v15 = vmul.f32 0.999, %v65_v38 }
 0x341   :  { %v108_v16 = vmul.f32 0.999, %v66_v46  ;;  %v730_v40 = vand.u32 65535, %v1885_v4 }
 0x342   :  { %v232_v31 = vadd.f32 %v190_v45, %v106_v28  ;;  %v233_v54 = vadd.f32 %v191_v8, %v107_v15 }
 0x343   :  { %v234_v55 = vadd.f32 %v192_v1, %v108_v16  ;;  %v732_v38 = vcvt.s32.f32 %v730_v40  ;;  %v200_v16 = vmul.f32 0.001, %v1686_v23  ;;  %v201_v1 = vmul.f32 0.001, %v1691_v24 }
 0x344   :  { %v1438_v27 = vpack.c.bf16 %v232_v31, %v231_v7  ;;  %v202_v24 = vmul.f32 0.001, %v1712_v29 }
 0x345   :  { %v1441_v10 = vpack.c.bf16 %v234_v55, %v233_v54 }
 0x346   :  { %1439 = vmatpush1.bf16.msra.mxu1 %v1438_v27 }
 0x347   :  { %v67_v44 = vld [vmem:[%s2394_s8 + $0xb0] sm:$0xff]  ;;  %v68_v5 = vld [vmem:[%s2394_s8 + $0xb8] sm:$0xff]  ;;  %1440 = vmatprep.subr.bf16.mxu1 %v1505_v0 }
 0x348   :  { %269 = vst [vmem:[%s2395_s14 + $0x70] sm:$0xff] %v227_v49  ;;  %270 = vst [vmem:[%s2395_s14 + $0x78] sm:$0xff] %v228_v6  ;;  %v109_v51 = vmul.f32 0.999, %v67_v44  ;;  %v110_v34 = vmul.f32 0.999, %v68_v5  ;;  %v693_v49 = vpop.permute.xlu0 %692 }
 0x349   :  { %271 = vst [vmem:[%s2395_s14 + $0x80] sm:$0xff] %v229_v11  ;;  %272 = vst [vmem:[%s2395_s14 + $0x88] sm:$0xff] %v230_v2  ;;  %v696_v52 = vsel %vm695_vm5, %v693_v49, 0.0  ;;  %v197_v6 = vmul.f32 0.001, %v1650_v14 }
 0x34a   :  { %273 = vst [vmem:[%s2395_s14 + $0x90] sm:$0xff] %v231_v7  ;;  %274 = vst [vmem:[%s2395_s14 + $0x98] sm:$0xff] %v232_v31  ;;  %v235_v12 = vadd.f32 %v193_v3, %v109_v51  ;;  %v236_v57 = vadd.f32 %v194_v19, %v110_v34  ;;  %1442 = vmatpush1.bf16.msra.mxu1 %v1441_v10  ;;  %v203_v51 = vmul.f32 0.001, %v1717_v30 }
 0x34b   :  { %275 = vst [vmem:[%s2395_s14 + $0xa0] sm:$0xff] %v233_v54  ;;  %276 = vst [vmem:[%s2395_s14 + $0xa8] sm:$0xff] %v234_v55  ;;  %1443 = vmatprep.subr.bf16.mxu1 %v1505_v0 }
 0x34c   :  { %277 = vst [vmem:[%s2395_s14 + $0xb0] sm:$0xff] %v235_v12  ;;  %278 = vst [vmem:[%s2395_s14 + $0xb8] sm:$0xff] %v236_v57  ;;  %v1444_v33 = vpack.c.bf16 %v236_v57, %v235_v12 }
 0x34e   :  { %1445 = vmatpush1.bf16.msra.mxu1 %v1444_v33 }
 0x34f   :  { %1340 = vmatprep.subr.mxu1 %v1507_v63 }
 0x351   :  { %610 = vmatmul.mubr.f32.vlgmr.msra.gmra.mrb[2].mxu1 %v494_v59 }
 0x352   :  { %1342 = vmatprep.mubr.msk.f32.mxu1 %vm1506_vm1, %v1507_v63 }
 0x353   :  { %v70_v4 = vld [vmem:[%s2394_s8 + $0xc8] sm:$0xff]  ;;  %v72_v44 = vld [vmem:[%s2394_s8 + $0xd8] sm:$0xff]  ;;  %v73_v5 = vld [vmem:[%s2394_s8 + $0xe0] sm:$0xff] }
 0x354   :  { %v112_v20 = vmul.f32 0.999, %v70_v4  ;;  %v114_v11 = vmul.f32 0.999, %v72_v44  ;;  %v115_v28 = vmul.f32 0.999, %v73_v5 }
 0x355   :  { %v74_v14 = vld [vmem:[%s2394_s8 + $0xe8] sm:$0xff]  ;;  %v75_v15 = vld [vmem:[%s2394_s8 + $0xf0] sm:$0xff] }
 0x356   :  { %v238_v45 = vadd.f32 %v196_v39, %v112_v20  ;;  %v240_v7 = vadd.f32 %v198_v21, %v114_v11  ;;  %v116_v31 = vmul.f32 0.999, %v74_v14  ;;  %v117_v8 = vmul.f32 0.999, %v75_v15 }
 0x357   :  { %v241_v18 = vadd.f32 %v199_v13, %v115_v28  ;;  %v208_v39 = vmul.f32 0.001, %v1790_v47  ;;  %v210_v14 = vmul.f32 0.001, %v1848_v60  ;;  %v211_v15 = vmul.f32 0.001, %v1853_v61 }
 0x358   :  { %v242_v34 = vadd.f32 %v200_v16, %v116_v31  ;;  %v243_v3 = vadd.f32 %v201_v1, %v117_v8  ;;  %v842_v60 = vshrl.u32 %v725_v53, 7 }
 0x359   :  { %v1450_v29 = vpack.c.bf16 %v241_v18, %v240_v7 }
 0x35a   :  { %v1453_v49 = vpack.c.bf16 %v243_v3, %v242_v34  ;;  %vm843_vm6 = vcmp.gt.s32.totalorder %v1881_v56, %v842_v60 }
 0x3a4   :  { %v2096_v43 = vpop.xlane.xlu1 %734 }
 0x3a5   :  { %vm736_vm4 = vcmp.eq.f32.partialorder %v1888_v9, %v2096_v43  ;;  %v71_v9 = vld [vmem:[%s2394_s8 + $0xd0] sm:$0xff]  ;;  %v741_v61 = vcvt.f32.s32 %v2096_v43  ;;  %v1215_v43 = vsel %vm843_vm6, 1.0, %v1507_v63  ;;  %vm1165_vm6 = vcmask 138240  }
 0x3a6   :  { %v737_v46 = vsel %vm736_vm4, %v732_v38, inf  ;;  %v113_v25 = vmul.f32 0.999, %v71_v9  ;;  %280 = vst [vmem:[%s2395_s14 + $0xc8] sm:$0xff] %v238_v45  ;;  %vm1472_vm4 = vmpackc.low %vm748_vm3, %vm748_vm3 }
 0x3a7   :  { %738 = vmin.xlane.f32.xlu1 %v737_v46  ;;  %v206_v46 = vmul.f32 0.001, %v1764_v41 }
 0x3a8   :  { %v239_v2 = vadd.f32 %v197_v6, %v113_v25  ;;  %v153_v25 = vld [vmem:[%s2391_s7 + $0xc0] sm:$0xff] }
 0x3a9   :  { %v195_v5 = vmul.f32 0.001, %v153_v25 }
 0x3aa   :  { %281 = vst [vmem:[%s2395_s14 + $0xd0] sm:$0xff] %v239_v2  ;;  %v1447_v17 = vpack.c.bf16 %v239_v2, %v238_v45 }
 0x3ab   :  { %697 = vadd.xlane.f32.xlu1 %v696_v52  ;;  %v207_v52 = vmul.f32 0.001, %v1769_v42  ;;  %v209_v42 = vmul.f32 0.001, %v1795_v48 }
 0x3ac   :  { %1448 = vmatpush3.bf16.msra.mxu0 %v1447_v17 }
 0x3ad   :  { %1449 = vmatprep.subr.bf16.mxu0 %v1505_v0 }
 0x3b0   :  { %1451 = vmatpush3.bf16.msra.mxu0 %v1450_v29 }
 0x3b1   :  { %v76_v50 = vld [vmem:[%s2394_s8 + $0xf8] sm:$0xff]  ;;  %v77_v23 = vld [vmem:[%s2394_s8 + $0x100] sm:$0xff]  ;;  %1452 = vmatprep.subr.bf16.mxu0 %v1505_v0 }
 0x3b2   :  { %282 = vst [vmem:[%s2395_s14 + $0xd8] sm:$0xff] %v240_v7  ;;  %v118_v54 = vmul.f32 0.999, %v76_v50  ;;  %v119_v55 = vmul.f32 0.999, %v77_v23  ;;  %v1097_v50 = vstv %s1096_s29  ;;  %v1092_v23 = vadd.s32 8, %v842_v60 }
 0x3b3   :  { %vm1098_vm8 = vcmp.lt.s32.totalorder %v842_v60, %v1097_v50 }
 0x3b4   :  { %v244_v58 = vadd.f32 %v202_v24, %v118_v54  ;;  %v245_v32 = vadd.f32 %v203_v51, %v119_v55  ;;  %1454 = vmatpush3.bf16.msra.mxu0 %v1453_v49  ;;  %v742_v24 = vshll.u32 %v741_v61, 16  ;;  %vm1099_vm11 = vcmp.lt.s32.totalorder %v1092_v23, %v1097_v50  ;;  %v2256_v55 = vld [vmem:[%s2398_s6] sm:$0xff] }
 0x3b5   :  { %1455 = vmatprep.subr.bf16.mxu0 %v1505_v0 }
 0x3b6   :  { %v1456_v48 = vpack.c.bf16 %v245_v32, %v244_v58 }
 0x3b8   :  { %1457 = vmatpush3.bf16.msra.mxu0 %v1456_v48 }
 0x3b9   :  { %v78_v19 = vld [vmem:[%s2394_s8 + $0x108] sm:$0xff]  ;;  %v79_v12 = vld [vmem:[%s2394_s8 + $0x110] sm:$0xff]  ;;  %1458 = vmatprep.subr.bf16.mxu0 %v1505_v0 }
 0x3ba   :  { %283 = vst [vmem:[%s2395_s14 + $0xe0] sm:$0xff] %v241_v18  ;;  %v120_v30 = vmul.f32 0.999, %v78_v19  ;;  %v121_v57 = vmul.f32 0.999, %v79_v12  ;;  %284 = vst [vmem:[%s2395_s14 + $0xe8] sm:$0xff] %v242_v34  ;;  %v1093_v18 = vstv %s2397_s3 }
 0x3bb   :  { %285 = vst [vmem:[%s2395_s14 + $0xf0] sm:$0xff] %v243_v3  ;;  %vm1094_vm7 = vcmp.ge.s32.totalorder %v842_v60, %v1093_v18  ;;  %vm1095_vm10 = vcmp.ge.s32.totalorder %v1092_v23, %v1093_v18 }
 0x3bc   :  { %v246_v33 = vadd.f32 %v204_v37, %v120_v30  ;;  %v247_v36 = vadd.f32 %v205_v26, %v121_v57  ;;  %vm2248_vm14 = vmand %vm1094_vm7, %vm1098_vm8 }
 0x3bd   :  { %vm2263_vm15 = vmand %vm1095_vm10, %vm1099_vm11 }
 0x3be   :  { %v1459_v28 = vpack.c.bf16 %v247_v36, %v246_v33 }
 0x3c0   :  { %1460 = vmatpush3.bf16.msra.mxu0 %v1459_v28 }
 0x3c1   :  { %1461 = vmatprep.subr.bf16.mxu0 %v1505_v0 }
 0x3c2   :  { %v80_v27 = vld [vmem:[%s2394_s8 + $0x118] sm:$0xff]  ;;  %v81_v35 = vld [vmem:[%s2394_s8 + $0x120] sm:$0xff]  ;;  %v82_v10 = vld [vmem:[%s2394_s8 + $0x128] sm:$0xff] }
 0x3c3   :  { %v122_v40 = vmul.f32 0.999, %v80_v27  ;;  %v123_v38 = vmul.f32 0.999, %v81_v35  ;;  %286 = vst [vmem:[%s2395_s14 + $0xf8] sm:$0xff] %v244_v58  ;;  %287 = vst [vmem:[%s2395_s14 + $0x100] sm:$0xff] %v245_v32 }
 0x3c4   :  { %v124_v62 = vmul.f32 0.999, %v82_v10  ;;  %v2293_v27 = vld [vmem:[%s2400_s4] sm:$0xff]  ;;  %v2298_v35 = vld [vmem:[%s2400_s4 + $0x8] sm:$0x3] }
 0x3c5   :  { %v248_v4 = vadd.f32 %v206_v46, %v122_v40  ;;  %v249_v6 = vadd.f32 %v207_v52, %v123_v38  ;;  %v1471_v10 = vpack.c.bf16 %v2298_v35, %v2293_v27 }
 0x3c6   :  { %v250_v44 = vadd.f32 %v208_v39, %v124_v62  ;;  %v170_v62 = vld [vmem:[%s2391_s7 + $0x148] sm:$0xff] }
 0x3c7   :  { %v1462_v21 = vpack.c.bf16 %v249_v6, %v248_v4 }
 0x3c9   :  { %1463 = vmatpush3.bf16.msra.mxu0 %v1462_v21 }
 0x3ca   :  { %v83_v59 = vld [vmem:[%s2394_s8 + $0x130] sm:$0xff]  ;;  %v69_v41 = vld [vmem:[%s2394_s8 + $0xc0] sm:$0xff]  ;;  %1464 = vmatprep.subr.bf16.mxu0 %v1505_v0 }
 0x3cb   :  { %288 = vst [vmem:[%s2395_s14 + $0x108] sm:$0xff] %v246_v33  ;;  %v125_v9 = vmul.f32 0.999, %v83_v59  ;;  %289 = vst [vmem:[%s2395_s14 + $0x110] sm:$0xff] %v247_v36  ;;  %v111_v20 = vmul.f32 0.999, %v69_v41 }
 0x3cc   :  { %290 = vst [vmem:[%s2395_s14 + $0x118] sm:$0xff] %v248_v4  ;;  %291 = vst [vmem:[%s2395_s14 + $0x120] sm:$0xff] %v249_v6  ;;  %v212_v4 = vmul.f32 0.001, %v170_v62 }
 0x3cd   :  { %v251_v47 = vadd.f32 %v209_v42, %v125_v9  ;;  %292 = vst [vmem:[%s2395_s14 + $0x128] sm:$0xff] %v250_v44  ;;  %v237_v11 = vadd.f32 %v195_v5, %v111_v20 }
 0x3cf   :  { %293 = vst [vmem:[%s2395_s14 + $0x130] sm:$0xff] %v251_v47  ;;  %279 = vst [vmem:[%s2395_s14 + $0xc0] sm:$0xff] %v237_v11  ;;  %v1465_v45 = vpack.c.bf16 %v251_v47, %v250_v44 }
 0x3d1   :  { %1466 = vmatpush3.bf16.msra.mxu0 %v1465_v45 }
 0x3d2   :  { %1467 = vmatprep.subr.bf16.mxu0 %v1505_v0 }
 0x3d6   :  { %v84_v2 = vld [vmem:[%s2394_s8 + $0x138] sm:$0xff]  ;;  %v85_v13 = vld [vmem:[%s2394_s8 + $0x140] sm:$0xff] }
 0x3d7   :  { %v126_v16 = vmul.f32 0.999, %v84_v2  ;;  %v127_v7 = vmul.f32 0.999, %v85_v13  ;;  %v1208_v57 = vld [vmem:[%s2395_s14 + $0xc0] ss:$0 sm:$0xff] }
 0x3d9   :  { %v252_v31 = vadd.f32 %v210_v14, %v126_v16  ;;  %v253_v8 = vadd.f32 %v211_v15, %v127_v7  ;;  %v1509_v7 = vmov 16  }
 0x3da   :  { %1481 = vset.pattern.permute.xlu0 %v1509_v7 }
 0x3db   :  { %294 = vst [vmem:[%s2395_s14 + $0x138] sm:$0xff] %v252_v31  ;;  %295 = vst [vmem:[%s2395_s14 + $0x140] sm:$0xff] %v253_v8  ;;  %v1468_v1 = vpack.c.bf16 %v253_v8, %v252_v31 }
 0x3dd   :  { %1469 = vmatpush3.bf16.msra.mxu0 %v1468_v1 }
 0x3de   :  { %1470 = vmatprep.subr.bf16.mxu0 %v1505_v0 }
 0x3e2   :  { %v86_v59 = vld [vmem:[%s2394_s8 + $0x148] sm:$0xff] }
 0x3e3   :  { %v128_v41 = vmul.f32 0.999, %v86_v59 }
 0x3e5   :  { %v254_v9 = vadd.f32 %v212_v4, %v128_v41 }
 0x3e7   :  { %296 = vst [vmem:[%s2395_s14 + $0x148] sm:$0xff] %v254_v9 }
 0x3ee   :  { %v1210_v15 = vld [vmem:[%s2395_s14 + $0x148] ss:$0 sm:$0xff] }
 0x424   :  { %v611_v37 = vpop.f32.mrb[2].mxu1 }
 0x425   :  { %v612_v58 = vadd.f32 %v1208_v57, %v611_v37  ;;  %v613_v32 = vpop.f32.mrb[3].mxu1 }
 0x427   :  { %v615_v26 = vmax.f32 %v612_v58, 0.0 }
 0x429   :  { %1331 = vmatmul.mubr.f32.vlgmr.msra.gmra.mrb[2].mxu0 %v615_v26 }
 0x42a   :  { %1337 = vmatprep.mubr.msk.f32.mxu0 %vm1506_vm1, %v1507_v63  ;;  %1473 = vmatpush3.bf16.xpose.msk.msra.mxu0 %vm1472_vm4, %v1471_v10  ;;  %vm1079_vm1 = vcmask 123904  }
 0x434   :  { %v739_v17 = vpop.xlane.xlu1 %738 }
 0x435   :  { %v740_v51 = vcvt.f32.s32 %v739_v17 }
 0x437   :  { %v743_v0 = vadd.s32 %v742_v24, %v740_v51 }
 0x438   :  { %v698_v33 = vpop.xlane.xlu1 %697 }
 0x439   :  { %v744_v53 = vcvt.s32.f32 %v743_v0  ;;  %vm838_vm12 = vcmp.eq.s32.totalorder %v1881_v56, %v743_v0  ;;  %v2261_v56 = vld [vmem:[%s2398_s6 + $0x8] sm:$0xff]  ;;  %v699_v46 = vmax.f32 %v698_v33, 1e-24 }
 0x43a   :  { %v1214_v34 = vsel %vm838_vm12, 1.0, %v1507_v63 }
 0x43b   :  { %1341 = vmatpush3.msk.msra.mxu1 %vm850_vm9, %v1214_v34  ;;  %v1131_v54 = vrot.slane %v744_v53, 4  ;;  %1487 = vrsqrt.f32 %v699_v46 }
 0x43c   :  { %1343 = vmatmul.mubr.msk.f32.vlgmr.msra.gmra.mrb[4].mxu1 %vm846_vm13, %v1215_v43 }
 0x43d   :  { %v2269_v12 = vsel %vm850_vm9, %v744_v53, %v1131_v54 }
 0x43e   :  { %v1134_v29 = vsel %vm2248_vm14, %v2269_v12, %v2256_v55  ;;  %v1135_v30 = vsel %vm2263_vm15, %v2269_v12, %v2261_v56 }
 0x43f   :  { %1137 = vst.msk [vmem:[%s2399_s13] sm:$0xff] %vm1136_vm0, %v1134_v29  ;;  %1138 = vst.msk [vmem:[%s2399_s13 + $0x8] sm:$0xff] %vm1136_vm0, %v1135_v30  ;;  %v41_v29 = vld [vmem:[%s2401_s5] sm:$0xff]  ;;  %v42_v30 = vld [vmem:[%s2401_s5 + $0x8] sm:$0xff]  ;;  %s1511_s5 = smov 16  }
 0x445   :  { %v1488_v36 = vpop.eup %1487 }
 0x446   :  { %v2306_v52 = vmul.f32 %v1488_v36, %v1868_v22 }
 0x4fc   :  { %v686_v39 = vpop.f32.mrb[2].mxu0 }
 0x4fd   :  { %v1332_v42 = vpop.f32.mrb[3].mxu0  ;;  %v687_v16 = vadd.f32 %v1210_v15, %v686_v39 }
 0x4ff   :  { %v702_v31 = vmul.f32 %v687_v16, %v687_v16 }
 0x50f   :  { %v920_v63 = vpop.f32.mrb[4].mxu1 }
 0x510   :  { %v924_v40 = vmul.f32 %v1214_v34, %v920_v63  ;;  %v1344_v38 = vpop.f32.mrb[5].mxu1 }
 0x512   :  { %v925_v49 = vsel %vm713_vm2, %v924_v40, 0.0 }
 0x513   :  { %926 = vadd.xlane.f32.xlu1 %v925_v49 }
 0x524   :  { %746 = vrot.lane.b32.xlu1 %v2306_v52, %s1508_s17 }
 0x54d   :  { %938 = vxpose.xlu1.b32.start.end [1/1] (short) (narrow) %v1214_v34, 16 }
 0x56b   :  { %1482 = vset.pattern.permute.xlu1 %v1509_v7 }
 0x5a0   :  { %v927_v6 = vpop.xlane.xlu1 %926 }
 0x5a1   :  { %v928_v20 = vmul.f32 -0.010050336, %v927_v6 }
 0x5a3   :  { %v929_v25 = vmul.f32 1.442695, %v928_v20 }
 0x5a4   :  { %v747_v44 = vpop.permute.xlu1 %746 }
 0x5a5   :  { %1489 = vpow2.f32 %v929_v25  ;;  %1338 = vmatmul.mubr.msk.f32.vlgmr.msra.gmra.mrb[4].mxu0 %vm748_vm3, %v747_v44 }
 0x5af   :  { %v1490_v47 = vpop.eup %1489 }
 0x5b0   :  { %v931_v5 = vmul.f32 0.01, %v1490_v47 }
 0x5b2   :  { %v932_v48 = vmul.f32 %v931_v5, %v2306_v52 }
 0x5b4   :  { %934 = vrot.lane.b32.xlu0 %v932_v48, %s1508_s17 }
 0x5cd   :  { %v954_v11 = vpop.trf.xlu1 }
 0x5ce   :  { %1347 = vmatprep.mubr.msk.f32.mxu1 %vm846_vm13, %v954_v11 }
 0x5d1   :  { %v955_v45 = vpop.trf.xlu1 }
 0x626   :  { %v935_v28 = vpop.permute.xlu0 %934 }
 0x627   :  { %v937_v21 = vsel %vm748_vm3, %v935_v28, 1.0 }
 0x628   :  { %1345 = vmatprep.subr.msk.mxu1 %vm850_vm9, %v937_v21 }
 0x629   :  { %1346 = vmatpush3.msk.msra.mxu1 %vm850_vm9, %v937_v21 }
 0x62a   :  { %1348 = vmatmul.mubr.msk.f32.vlgmr.msra.gmra.mrb[6].mxu1 %vm846_vm13, %v955_v45 }
 0x678   :  { %v823_v2 = vpop.f32.mrb[4].mxu0 }
 0x679   :  { %v1339_v13 = vpop.f32.mrb[5].mxu0  ;;  %v827_v14 = vsel %vm713_vm2, %v823_v2, -inf }
 0x67a   :  { %828 = vmax.xlane.f32.xlu0 %v827_v14 }
 0x690   :  { %704 = vrot.lane.b32.xlu0 %v702_v31, %s1508_s17 }
 0x6fd   :  { %v1349_v8 = vpop.f32.mrb[6].mxu1 }
 0x6fe   :  { %v1055_v1 = vmul.f32 -0.010050336, %v1349_v8  ;;  %v1045_v60 = vpop.f32.mrb[7].mxu1 }
 0x6ff   :  { %v1054_v61 = vmul.f32 -0.010050336, %v1045_v60 }
 0x700   :  { %v1058_v17 = vmul.f32 1.442695, %v1055_v1 }
 0x701   :  { %v1056_v18 = vmul.f32 1.442695, %v1054_v61 }
 0x702   :  { %1491 = vpow2.f32 %v1058_v17 }
 0x703   :  { %1493 = vpow2.f32 %v1056_v18 }
 0x707   :  { %v829_v24 = vpop.xlane.xlu0 %828 }
 0x708   :  { %v830_v51 = vsub.f32 %v823_v2, %v829_v24 }
 0x70a   :  { %v831_v0 = vmul.f32 1.442695, %v830_v51 }
 0x70b   :  { %v705_v53 = vpop.permute.xlu0 %704 }
 0x70c   :  { %v1492_v50 = vpop.eup %1491  ;;  %1495 = vpow2.f32 %v831_v0  ;;  %v707_v43 = vsel %vm695_vm5, %v705_v53, 0.0  ;;  %vm1178_vm5 = vcmask 162816  }
 0x70d   :  { %v1494_v23 = vpop.eup %1493  ;;  %1067 = vperm.xlu0 %1481, %v1492_v50  }
 0x70e   :  { %1062 = vperm.xlu1 %1482, %v1494_v23  }
 0x716   :  { %v1496_v34 = vpop.eup %1495 }
 0x717   :  { %v833_v54 = vsel %vm713_vm2, %v1496_v34, 0.0  ;;  %vm1176_vm2 = vcmask 80896  }
 0x72c   :  { %708 = vadd.xlane.f32.xlu0 %v707_v43 }
 0x732   :  { %834 = vadd.xlane.f32.xlu1 %v833_v54 }
 0x742   :  { %1112 = vrot.lane.b32.xlu0 %v41_v29, %s1510_s16 }
 0x743   :  { %1114 = vrot.lane.b32.xlu1 %v42_v30, %s1510_s16 }
 0x78c   :  { %v1068_v57 = vpop.permute.xlu0 %1067 }
 0x78d   :  { %v1063_v32 = vpop.permute.xlu1 %1062  ;;  %v1071_v59 = vmul.f32 %v1068_v57, %v2298_v35 }
 0x78f   :  { %v1073_v62 = vadd.f32 %v1349_v8, %v1071_v59 }
 0x791   :  { %v1075_v41 = vmul.f32 %v1073_v62, %v1073_v62 }
 0x793   :  { %v1080_v4 = vsel %vm1079_vm1, %v1075_v41, 0.0 }
 0x7b9   :  { %v709_v37 = vpop.xlane.xlu0 %708 }
 0x7ba   :  { %v710_v58 = vmax.f32 %v709_v37, 1e-24 }
 0x7bc   :  { %1497 = vrsqrt.f32 %v710_v58 }
 0x7bd   :  { %v1113_v26 = vpop.permute.xlu0 %1112 }
 0x7be   :  { %1143 = vrot.lane.b32.xlu1 %v1113_v26, %s1508_s17 }
 0x7bf   :  { %v835_v10 = vpop.xlane.xlu1 %834 }
 0x7c0   :  { %1499 = vrcp.f32 %v835_v10 }
 0x7c3   :  { %v1115_v36 = vpop.permute.xlu1 %1114 }
 0x7c6   :  { %v1498_v33 = vpop.eup %1497 }
 0x7c7   :  { %v712_v63 = vmul.f32 %v1498_v33, %v687_v16 }
 0x7c9   :  { %v1103_v40 = vrot.slane %v712_v63, 4 }
 0x7ca   :  { %v1500_v38 = vpop.eup %1499 }
 0x7cb   :  { %v1139_v46 = vsel %vm850_vm9, %v2306_v52, %v1103_v40  ;;  %v837_v49 = vmul.f32 %v1500_v38, %v1496_v34  ;;  %v1070_v52 = vmul.f32 %v1063_v32, %v2293_v27 }
 0x7cc   :  { %1141 = vrot.lane.b32.xlu0 %v1139_v46, %s1508_s17 }
 0x7cd   :  { %1173 = vrot.lane.b32.xlu1 %v837_v49, %s1510_s16  ;;  %v1072_v9 = vadd.f32 %v1070_v52, %v1045_v60 }
 0x7cf   :  { %v1074_v39 = vmul.f32 %v1072_v9, %v1072_v9 }
 0x7d0   :  { %1145 = vrot.lane.b32.xlu0 %v1115_v36, %s1508_s17 }
 0x7d1   :  { %v1076_v42 = vsel %vm748_vm3, %v1074_v39, 0.0 }
 0x7d4   :  { %1153 = vrot.lane.b32.xlu0 %v2269_v12, %s1511_s5  ;;  %v1105_v12 = vsel %vm850_vm9, %v712_v63, %v1103_v40 }
 0x7d8   :  { %1155 = vrot.lane.b32.xlu0 %v2256_v55, %s1511_s5  ;;  %v1119_v55 = vsel %vm2263_vm15, %v1105_v12, %v1115_v36 }
 0x7dc   :  { %1157 = vrot.lane.b32.xlu0 %v2261_v56, %s1511_s5  ;;  %v1118_v56 = vsel %vm2248_vm14, %v1105_v12, %v1113_v26 }
 0x7f1   :  { %1081 = vadd.xlane.f32.xlu1 %v1080_v4 }
 0x7fb   :  { %1077 = vadd.xlane.f32.xlu0 %v1076_v42 }
 0x802   :  { %1124 = vrot.lane.b32.xlu1 %v1119_v55, %s1508_s17 }
 0x811   :  { %1122 = vrot.lane.b32.xlu0 %v1118_v56, %s1508_s17 }
 0x830   :  { %v1144_v27 = vpop.permute.xlu1 %1143 }
 0x83e   :  { %v1142_v35 = vpop.permute.xlu0 %1141 }
 0x83f   :  { %v1174_v6 = vpop.permute.xlu1 %1173 }
 0x840   :  { %v1177_v20 = vsel %vm1176_vm2, %v1868_v22, %v1174_v6 }
 0x841   :  { %v1179_v25 = vsel %vm1178_vm5, %v1177_v20, 0.0 }
 0x842   :  { %1180 = vst [vmem:[%s2402_s9] sm:$0xf] %v1179_v25  ;;  %v1146_v19 = vpop.permute.xlu0 %1145 }
 0x846   :  { %v1154_v44 = vpop.permute.xlu0 %1153 }
 0x847   :  { %v1162_v3 = vsel %vm748_vm3, %v1142_v35, %v1154_v44 }
 0x848   :  { %v1166_v47 = vsel %vm1165_vm6, %v1162_v3, 0.0 }
 0x849   :  { %1169 = vst [vmem:[%s2403_s10] sm:$0xff] %v1166_v47 }
 0x84a   :  { %v1156_v5 = vpop.permute.xlu0 %1155 }
 0x84b   :  { %v1163_v48 = vsel %vm748_vm3, %v1144_v27, %v1156_v5 }
 0x84c   :  { %v1167_v11 = vsel %vm1165_vm6, %v1163_v48, 0.0 }
 0x84d   :  { %1170 = vst [vmem:[%s2403_s10 + $0x8] sm:$0xff] %v1167_v11 }
 0x84e   :  { %v1158_v22 = vpop.permute.xlu0 %1157 }
 0x84f   :  { %v1164_v28 = vsel %vm748_vm3, %v1146_v19, %v1158_v22 }
 0x850   :  { %v1168_v21 = vsel %vm1165_vm6, %v1164_v28, 0.0 }
 0x851   :  { %1171 = vst [vmem:[%s2403_s10 + $0x10] sm:$0xff] %v1168_v21 }
 0x87e   :  { %v1082_v45 = vpop.xlane.xlu1 %1081 }
 0x87f   :  { %v1084_v2 = vmax.f32 %v1082_v45, 1e-24 }
 0x881   :  { %1501 = vrsqrt.f32 %v1084_v2 }
 0x882   :  { %v1125_v13 = vpop.permute.xlu1 %1124 }
 0x883   :  { %1129 = vst.msk [vmem:[%s2404_s12 + $0x8] sm:$0xff] %vm748_vm3, %v1125_v13 }
 0x888   :  { %v1078_v14 = vpop.xlane.xlu0 %1077 }
 0x889   :  { %v1083_v15 = vmax.f32 %v1078_v14, 1e-24 }
 0x88b   :  { %v1502_v16 = vpop.eup %1501  ;;  %1503 = vrsqrt.f32 %v1083_v15 }
 0x88c   :  { %v1088_v7 = vmul.f32 %v1502_v16, %v1073_v62  ;;  %v1123_v31 = vpop.permute.xlu0 %1122 }
 0x88d   :  { %1128 = vst.msk [vmem:[%s2404_s12] sm:$0xff] %vm748_vm3, %v1123_v31 }
 0x88e   :  { %1090 = vst.msk [vmem:[%s2405_s11 + $0x8] sm:$0x3] %vm1079_vm1, %v1088_v7 }
 0x895   :  { %v1504_v8 = vpop.eup %1503 }
 0x896   :  { %v1087_v1 = vmul.f32 %v1504_v8, %v1072_v9 }
 0x898   :  { %1089 = vst.msk [vmem:[%s2405_s11] sm:$0xff] %vm748_vm3, %v1087_v1 }

</bundles_post_ra>
